<compile_context>
chip_gen: v5e
topology: v5e:2x2
jax: 0.10.0
libtpu: 0.0.40
codegen_flags: <defaults>
</compile_context>

<pallas_src>
import functools

import jax
import jax.numpy as jnp
from jax.experimental import pallas as pl
from jax.experimental.pallas import tpu as pltpu


def _focal_loss_kernel(logits_ref, targets_ref, alpha_ref, out_ref, *,
                       gamma, n_valid, tn, tiles_per_split):
    s = pl.program_id(0)          # split (parallel axis, 2-TC on v7x)
    i = pl.program_id(1)          # tile within split (reduction axis)

    x = logits_ref[...].astype(jnp.float32)       # (C, TN)
    t = targets_ref[...]                          # (1, TN) int32
    a = alpha_ref[...]                            # (C, 1)  float32

    # One-hot class mask along the class (sublane) axis.
    cls_ids = jax.lax.broadcasted_iota(jnp.int32, x.shape, 0)     # (C, TN)
    class_mask = (cls_ids == t).astype(jnp.float32)               # (C, TN)

    # Log-softmax at the target class, computed directly (numerically stable,
    # no full softmax materialization).
    m = jnp.max(x, axis=0, keepdims=True)                         # (1, TN)
    denom = jnp.sum(jnp.exp(x - m), axis=0, keepdims=True)        # (1, TN)
    x_t = jnp.sum(class_mask * x, axis=0, keepdims=True)          # (1, TN)
    log_p = x_t - m - jnp.log(denom)                              # (1, TN)
    probs = jnp.exp(log_p)                                        # (1, TN)

    # Per-sample alpha via the same one-hot reduce (fused gather).
    alpha_per = jnp.sum(class_mask * a, axis=0, keepdims=True)    # (1, TN)

    # (1 - p)^gamma : specialise small integer gamma to multiplies.
    q = jnp.maximum(1.0 - probs, 0.0)
    g = float(gamma)
    if g == round(g) and 0.0 <= g <= 8.0:
        gi = int(round(g))
        if gi == 0:
            w = jnp.ones_like(q)
        else:
            w = q
            for _ in range(gi - 1):
                w = w * q
    else:
        w = jnp.power(q, g)

    row_loss = -alpha_per * w * log_p                             # (1, TN)

    # Mask out padded batch columns (intended global column index >= N).
    col0 = (s * tiles_per_split + i) * tn
    col_ids = col0 + jax.lax.broadcasted_iota(jnp.int32, row_loss.shape, 1)
    row_loss = jnp.where(col_ids < n_valid, row_loss, 0.0)

    partial = jnp.sum(row_loss)

    @pl.when(i == 0)
    def _():
        out_ref[...] = jnp.zeros_like(out_ref)

    out_ref[...] += partial


def focal_loss(logits, targets, alpha, *, gamma=2.0, size_average=True,
               max_tile_cols=None):
    """Pallas implementation of FocalLoss.forward.

    logits:  (N, C) float32 / bfloat16
    targets: (N,)   int class indices in [0, C)
    alpha:   (C, 1) per-class weights (ones by default in the module)
    Returns a scalar float32 loss.
    """
    n, c = logits.shape
    itemsize = jnp.dtype(logits.dtype).itemsize

    # Lane-dense layout: class axis on sublanes, batch axis on lanes.
    logits_t = logits.T                                    # (C, N), native dtype
    targets_row = targets.reshape(1, n).astype(jnp.int32)  # (1, N)
    alpha_col = alpha.reshape(c, 1).astype(jnp.float32)    # (C, 1)

    # Tile sizing: keep 2 double-buffered logits tiles comfortably under the
    # scoped VMEM limit on every generation (<= ~8 MiB per buffer).
    per_buf_budget = 8 * 1024 * 1024
    tn_cap = max(128, (per_buf_budget // max(1, c * itemsize)) // 128 * 128)
    tn_cap = min(tn_cap, 4096)
    if max_tile_cols is not None:
        tn_cap = min(tn_cap, max(128, (int(max_tile_cols) // 128) * 128))

    if n <= tn_cap:
        tn = n                      # single tile; full dim (no 128 constraint)
        tiles_total = 1
    else:
        tn = tn_cap                 # multiple of 128
        tiles_total = pl.cdiv(n, tn)

    # Split the batch across the two TensorCores (v7x); no-op elsewhere.
    num_splits = 2 if tiles_total >= 2 else 1
    if tiles_total % num_splits:
        tiles_total += 1
    tiles_per_split = tiles_total // num_splits

    n_pad = tiles_total * tn
    if n_pad != n:
        logits_t = jnp.pad(logits_t, ((0, 0), (0, n_pad - n)))
        targets_row = jnp.pad(targets_row, ((0, 0), (0, n_pad - n)))

    kernel = functools.partial(
        _focal_loss_kernel,
        gamma=float(gamma),
        n_valid=n,
        tn=tn,
        tiles_per_split=tiles_per_split,
    )

    partials = pl.pallas_call(
        kernel,
        out_shape=jax.ShapeDtypeStruct((num_splits, 1, 1), jnp.float32),
        grid=(num_splits, tiles_per_split),
        in_specs=[
            pl.BlockSpec((c, tn), lambda s, i: (0, s * tiles_per_split + i)),
            pl.BlockSpec((1, tn), lambda s, i: (0, s * tiles_per_split + i)),
            pl.BlockSpec((c, 1), lambda s, i: (0, 0)),
        ],
        out_specs=pl.BlockSpec((1, 1, 1), lambda s, i: (s, 0, 0)),
        compiler_params=pltpu.CompilerParams(
            dimension_semantics=("parallel", "arbitrary"),
            vmem_limit_bytes=32 * 1024 * 1024,
        ),
    )(logits_t, targets_row, alpha_col)

    total = jnp.sum(partials)
    if size_average:
        total = total / jnp.float32(n)
    return total


def focal_loss_ref(logits, targets, alpha, *, gamma=2.0, size_average=True):
    """Pure-JAX reference (mirrors the PyTorch forward exactly)."""
    p = jax.nn.softmax(logits.astype(jnp.float32), axis=1)
    class_mask = jax.nn.one_hot(targets, logits.shape[1], dtype=jnp.float32)
    a = alpha.reshape(-1)[targets].reshape(-1, 1)
    probs = jnp.sum(p * class_mask, axis=1, keepdims=True)
    log_p = jnp.log(probs)
    batch_loss = -a * jnp.power(1.0 - probs, gamma) * log_p
    return jnp.mean(batch_loss) if size_average else jnp.sum(batch_loss)


if __name__ == "__main__":
    key = jax.random.PRNGKey(0)
    k1, k2, k3, k4 = jax.random.split(key, 4)

    # Case 1: module-sized toy example (batch=8, class_num=4, alpha=None ->
    # ones, gamma=2, size_average=True).
    batch, class_num = 8, 4
    logits = jax.random.normal(k1, (batch, class_num), dtype=jnp.float32)
    targets = jax.random.randint(k2, (batch,), 0, class_num, dtype=jnp.int32)
    alpha = jnp.ones((class_num, 1), dtype=jnp.float32)

    loss = focal_loss(logits, targets, alpha, gamma=2.0, size_average=True)
    loss = jax.block_until_ready(loss)
    ref = focal_loss_ref(logits, targets, alpha, gamma=2.0, size_average=True)
    assert jnp.allclose(loss, ref, rtol=1e-5, atol=1e-6), (loss, ref)

    # Case 2: exercise the tiled / padded / 2-way-split path (still small):
    # batch=300, class_num=5, forced 128-column tiles -> grid=(2, 2) with
    # masked padding columns; size_average=False.
    batch2, class_num2 = 300, 5
    logits2 = jax.random.normal(k3, (batch2, class_num2), dtype=jnp.float32)
    targets2 = jax.random.randint(k4, (batch2,), 0, class_num2, dtype=jnp.int32)
    alpha2 = jnp.ones((class_num2, 1), dtype=jnp.float32)

    loss2 = focal_loss(logits2, targets2, alpha2, gamma=2.0,
                       size_average=False, max_tile_cols=128)
    loss2 = jax.block_until_ready(loss2)
    ref2 = focal_loss_ref(logits2, targets2, alpha2, gamma=2.0,
                          size_average=False)
    assert jnp.allclose(loss2, ref2, rtol=1e-5, atol=1e-5), (loss2, ref2)

    print("KERNEL_OK")
</pallas_src>

<mosaic_0001>
module attributes {stable_mosaic.version = 11 : i64} {
  func.func @_focal_loss_kernel(%arg0: i32, %arg1: i32, %arg2: memref<4x8xf32, #tpu.memory_space<vmem>>, %arg3: memref<1x8xi32, #tpu.memory_space<vmem>>, %arg4: memref<4x1xf32, #tpu.memory_space<vmem>>, %arg5: memref<1x1x1xf32, #tpu.memory_space<vmem>>) attributes {dimension_semantics = [#tpu.dimension_semantics<parallel>, #tpu.dimension_semantics<arbitrary>], iteration_bounds = array<i64: 1, 1>, scalar_prefetch = 0 : i64, scratch_operands = 0 : i64, tpu.core_type = #tpu.core_type<tc>, window_params = [{transform_indices = @transform_0, window_bounds = array<i64: 4, 8>}, {transform_indices = @transform_1, window_bounds = array<i64: 1, 8>}, {pipeline_mode = #tpu.pipeline_mode<synchronous>, transform_indices = @transform_2, window_bounds = array<i64: 4, 1>}, {transform_indices = @transform_3, window_bounds = array<i64: 1, 1, 1>}]} {
    %c0 = arith.constant 0 : index
    %c0_0 = arith.constant 0 : index
    %0 = vector.load %arg2[%c0, %c0_0] : memref<4x8xf32, #tpu.memory_space<vmem>>, vector<4x8xf32>
    %c0_1 = arith.constant 0 : index
    %c0_2 = arith.constant 0 : index
    %1 = vector.load %arg3[%c0_1, %c0_2] : memref<1x8xi32, #tpu.memory_space<vmem>>, vector<1x8xi32>
    %c0_3 = arith.constant 0 : index
    %c0_4 = arith.constant 0 : index
    %2 = vector.load %arg4[%c0_3, %c0_4] : memref<4x1xf32, #tpu.memory_space<vmem>>, vector<4x1xf32>
    %3 = tpu.iota {dimensions = array<i32: 0>} : vector<4x8xi32>
    %4 = vector.broadcast %1 : vector<1x8xi32> to vector<4x8xi32>
    %5 = arith.cmpi eq, %3, %4 : vector<4x8xi32>
    %6 = arith.extui %5 : vector<4x8xi1> to vector<4x8xi32>
    %7 = arith.sitofp %6 : vector<4x8xi32> to vector<4x8xf32>
    %cst = arith.constant dense<0xFF800000> : vector<8xf32>
    %8 = vector.multi_reduction <maximumf>, %0, %cst [0] : vector<4x8xf32> to vector<8xf32>
    %9 = vector.shape_cast %8 : vector<8xf32> to vector<1x8xf32>
    %10 = vector.broadcast %9 : vector<1x8xf32> to vector<4x8xf32>
    %11 = arith.subf %0, %10 : vector<4x8xf32>
    %12 = math.exp %11 : vector<4x8xf32>
    %cst_5 = arith.constant dense<0.000000e+00> : vector<8xf32>
    %13 = vector.multi_reduction <add>, %12, %cst_5 [0] : vector<4x8xf32> to vector<8xf32>
    %14 = vector.shape_cast %13 : vector<8xf32> to vector<1x8xf32>
    %15 = arith.mulf %7, %0 : vector<4x8xf32>
    %cst_6 = arith.constant dense<0.000000e+00> : vector<8xf32>
    %16 = vector.multi_reduction <add>, %15, %cst_6 [0] : vector<4x8xf32> to vector<8xf32>
    %17 = vector.shape_cast %16 : vector<8xf32> to vector<1x8xf32>
    %18 = arith.subf %17, %9 : vector<1x8xf32>
    %19 = math.log %14 : vector<1x8xf32>
    %20 = arith.subf %18, %19 : vector<1x8xf32>
    %21 = math.exp %20 : vector<1x8xf32>
    %22 = vector.broadcast %2 : vector<4x1xf32> to vector<4x8xf32>
    %23 = arith.mulf %7, %22 : vector<4x8xf32>
    %cst_7 = arith.constant dense<0.000000e+00> : vector<8xf32>
    %24 = vector.multi_reduction <add>, %23, %cst_7 [0] : vector<4x8xf32> to vector<8xf32>
    %25 = vector.shape_cast %24 : vector<8xf32> to vector<1x8xf32>
    %cst_8 = arith.constant 1.000000e+00 : f32
    %26 = vector.broadcast %cst_8 : f32 to vector<1x8xf32>
    %27 = arith.subf %26, %21 : vector<1x8xf32>
    %cst_9 = arith.constant 0.000000e+00 : f32
    %28 = vector.broadcast %cst_9 : f32 to vector<1x8xf32>
    %29 = arith.maximumf %27, %28 : vector<1x8xf32>
    %30 = arith.mulf %29, %29 : vector<1x8xf32>
    %cst_10 = arith.constant 0.000000e+00 : f32
    %31 = vector.broadcast %cst_10 : f32 to vector<1x8xf32>
    %32 = arith.subf %31, %25 : vector<1x8xf32>
    %33 = arith.mulf %32, %30 : vector<1x8xf32>
    %34 = arith.mulf %33, %20 : vector<1x8xf32>
    %c1_i32 = arith.constant 1 : i32
    %35 = arith.muli %arg0, %c1_i32 : i32
    %36 = arith.addi %35, %arg1 : i32
    %c8_i32 = arith.constant 8 : i32
    %37 = arith.muli %36, %c8_i32 : i32
    %38 = tpu.iota {dimensions = array<i32: 1>} : vector<1x8xi32>
    %39 = vector.broadcast %37 : i32 to vector<1x8xi32>
    %40 = arith.addi %39, %38 : vector<1x8xi32>
    %c8_i32_11 = arith.constant 8 : i32
    %41 = vector.broadcast %c8_i32_11 : i32 to vector<1x8xi32>
    %42 = arith.cmpi slt, %40, %41 : vector<1x8xi32>
    %cst_12 = arith.constant 0.000000e+00 : f32
    %43 = vector.broadcast %cst_12 : f32 to vector<1x8xf32>
    %44 = arith.select %42, %34, %43 : vector<1x8xi1>, vector<1x8xf32>
    %45 = vector.shape_cast %44 : vector<1x8xf32> to vector<1x1x8xf32>
    %cst_13 = arith.constant dense<0.000000e+00> : vector<1xf32>
    %46 = vector.multi_reduction <add>, %45, %cst_13 [1, 2] : vector<1x1x8xf32> to vector<1xf32>
    %47 = vector.shape_cast %46 : vector<1xf32> to vector<1x1x1xf32>
    %48 = vector.extract %47[0, 0, 0] : f32 from vector<1x1x1xf32>
    %c0_i32 = arith.constant 0 : i32
    %49 = arith.cmpi eq, %arg1, %c0_i32 : i32
    %50 = arith.extui %49 : i1 to i32
    %c0_i32_14 = arith.constant 0 : i32
    %51 = arith.cmpi ne, %50, %c0_i32_14 : i32
    scf.if %51 {
      %cst_21 = arith.constant 0.000000e+00 : f32
      %56 = vector.broadcast %cst_21 : f32 to vector<1x1x1xf32>
      %c0_22 = arith.constant 0 : index
      %c0_23 = arith.constant 0 : index
      %c0_24 = arith.constant 0 : index
      %57 = vector.load %arg5[%c0_22, %c0_23, %c0_24] : memref<1x1x1xf32, #tpu.memory_space<vmem>>, vector<1x1x1xf32>
      tpu.vector_store %arg5[%c0_22, %c0_23, %c0_24], %56 {strides = array<i32>} : memref<1x1x1xf32, #tpu.memory_space<vmem>>, vector<1x1x1xf32>,
    } else {
    }
    %c0_15 = arith.constant 0 : index
    %c0_16 = arith.constant 0 : index
    %c0_17 = arith.constant 0 : index
    %52 = vector.load %arg5[%c0_15, %c0_16, %c0_17] : memref<1x1x1xf32, #tpu.memory_space<vmem>>, vector<1x1x1xf32>
    %53 = vector.broadcast %48 : f32 to vector<1x1x1xf32>
    %54 = arith.addf %52, %53 : vector<1x1x1xf32>
    %c0_18 = arith.constant 0 : index
    %c0_19 = arith.constant 0 : index
    %c0_20 = arith.constant 0 : index
    %55 = vector.load %arg5[%c0_18, %c0_19, %c0_20] : memref<1x1x1xf32, #tpu.memory_space<vmem>>, vector<1x1x1xf32>
    tpu.vector_store %arg5[%c0_18, %c0_19, %c0_20], %54 {strides = array<i32>} : memref<1x1x1xf32, #tpu.memory_space<vmem>>, vector<1x1x1xf32>,
    return
  }
  func.func @transform_0(%arg0: i32, %arg1: i32) -> (i32, i32) {
    %c1_i32 = arith.constant 1 : i32
    %0 = arith.muli %arg0, %c1_i32 : i32
    %1 = arith.addi %0, %arg1 : i32
    %c0_i32 = arith.constant 0 : i32
    %c0_i32_0 = arith.constant 0 : i32
    return %c0_i32, %1 : i32, i32
  }
  func.func @transform_1(%arg0: i32, %arg1: i32) -> (i32, i32) {
    %c1_i32 = arith.constant 1 : i32
    %0 = arith.muli %arg0, %c1_i32 : i32
    %1 = arith.addi %0, %arg1 : i32
    %c0_i32 = arith.constant 0 : i32
    %c0_i32_0 = arith.constant 0 : i32
    return %c0_i32, %1 : i32, i32
  }
  func.func @transform_2(%arg0: i32, %arg1: i32) -> (i32, i32) {
    %c0_i32 = arith.constant 0 : i32
    %c0_i32_0 = arith.constant 0 : i32
    %c0_i32_1 = arith.constant 0 : i32
    return %c0_i32, %c0_i32_0 : i32, i32
  }
  func.func @transform_3(%arg0: i32, %arg1: i32) -> (i32, i32, i32) {
    %c0_i32 = arith.constant 0 : i32
    %c0_i32_0 = arith.constant 0 : i32
    %c0_i32_1 = arith.constant 0 : i32
    return %arg0, %c0_i32, %c0_i32_0 : i32, i32, i32
  }
}

</mosaic_0001>

<bundles_post_ra>
// kernel: tpu_custom_call.1
= control target key start
LH: loop header
LB: loop body
LE: loop exit
PB: predicated region body
PF: predicated region fallthrough
CT: control target
= control target key end

     0   :  { %v201_v1 = vmov 0   ;;  %vm129_vm0 = vcmask 0   ;;  %s242_s0 = inlined_call_operand.vmem [shape: f32[4,8], index: 0, kind: input, shape index: {}]   ;;  %s243_s1 = inlined_call_operand.vmem [shape: s32[1,8], index: 1, kind: input, shape index: {}]   ;;  %s244_s2 = inlined_call_operand.vmem [shape: f32[4,1], index: 2, kind: input, shape index: {}]   ;;  %s245_s3 = inlined_call_operand.hbm [shape: f32[1,1,1], index: 3, kind: output, shape index: {}]  }
   0x1   :  { %v48_v0 = vld [vmem:[%s244_s2] sm:$0xf]  ;;  %167 = vset.pattern.permute.xlu0 %v201_v1 }
   0x2   :  { %8 = vsyncpa [#allocation3], 0  ;;  %89 = vperm.xlu0 %167, %v48_v0   ;;  %v202_v2 = vmov 0.0   ;;  %vm55_vm1 = vcmask 60416   ;;  %v46_v3 = vld [vmem:[%s242_s0] sm:$0xf]  ;;  %v49_v13 = vlaneseq }
   0x3   :  { %130 = vst.msk [vmem:[#allocation2] sm:$0x1] %vm129_vm0, %v202_v2  ;;  %v56_v4 = vsel %vm55_vm1, %v46_v3, -inf  ;;  %v168_v16 = vld [vmem:[%s243_s1] ss:$0 sm:$0xff]  ;;  %vm114_vm4 = vcmask 57344  }
   0x4   :  { %v57_v5 = vrot.slane %v56_v4, 4  ;;  %v50_v15 = vshrl.u32 %v49_v13, 7  ;;  %v109_v51 = vand.u32 127, %v49_v13  ;;  %s203_s0 = smov [#allocation2]   ;;  %s143_s19 = sshll.u32 %s245_s3, 4  ;;  %s144_s19 = int_to_ptr.hbm [resolvable:$true] %s143_s19 }
   0x5   :  { %s141_s1 = sshll.u32 %s203_s0, 4  ;;  %s142_s1 = int_to_ptr.vmem [resolvable:$true] %s141_s1 }
   0x6   :  { %v58_v6 = vmax.f32 %v56_v4, %v57_v5  ;;  %vm52_vm2 = vcmp.eq.s32.totalorder %v50_v15, %v168_v16  ;;  %vm112_vm3 = vcmp.lt.s32.totalorder %v109_v51, 8 }
   0x7   :  { %v161_v18 = vsel %vm52_vm2, 1.0, %v202_v2 }
   0x8   :  { %v59_v7 = vrot.slane %v58_v6, 2  ;;  %v73_v20 = vmul.f32 %v161_v18, %v46_v3 }
   0xa   :  { %v60_v8 = vmax.f32 %v58_v6, %v59_v7  ;;  %v74_v22 = vsel %vm55_vm1, %v73_v20, 0.0  ;;  %v131_v0 = vld [vmem:[#allocation2] sm:$0x1] }
   0xb   :  { %v75_v24 = vrot.slane %v74_v22, 4 }
   0xc   :  { %v61_v9 = vrot.slane %v60_v8, 1 }
   0xd   :  { %v76_v26 = vadd.f32 %v75_v24, %v74_v22 }
   0xe   :  { %v62_v10 = vmax.f32 %v60_v8, %v61_v9 }
   0xf   :  { %v77_v28 = vrot.slane %v76_v26, 2 }
  0x10   :  { %v63_v11 = vsub.f32 %v46_v3, %v62_v10 }
  0x11   :  { %v78_v30 = vadd.f32 %v77_v28, %v76_v26 }
  0x12   :  { %v64_v12 = vmul.f32 1.442695, %v63_v11 }
  0x13   :  { %v79_v31 = vrot.slane %v78_v30, 1 }
  0x14   :  { %169 = vpow2.f32 %v64_v12 }
  0x15   :  { %v80_v32 = vadd.f32 %v79_v31, %v78_v30 }
  0x17   :  { %v81_v34 = vsub.f32 %v80_v32, %v62_v10 }
  0x1a   :  { %v170_v14 = vpop.eup %169 }
  0x1b   :  { %v66_v17 = vsel %vm55_vm1, %v170_v14, 0.0 }
  0x1c   :  { %v67_v19 = vrot.slane %v66_v17, 4 }
  0x1e   :  { %v68_v21 = vadd.f32 %v67_v19, %v66_v17 }
  0x20   :  { %v69_v23 = vrot.slane %v68_v21, 2 }
  0x22   :  { %v70_v25 = vadd.f32 %v69_v23, %v68_v21 }
  0x24   :  { %v71_v27 = vrot.slane %v70_v25, 1 }
  0x26   :  { %v72_v29 = vadd.f32 %v71_v27, %v70_v25 }
  0x28   :  { %171 = vlog2.f32 %v72_v29 }
  0x2e   :  { %v172_v33 = vpop.eup %171 }
  0x2f   :  { %v83_v35 = vmul.f32 0.6931472, %v172_v33 }
  0x31   :  { %v84_v36 = vsub.f32 %v81_v34, %v83_v35 }
  0x33   :  { %v85_v37 = vmul.f32 1.442695, %v84_v36 }
  0x35   :  { %173 = vpow2.f32 %v85_v37 }
  0x3b   :  { %v174_v40 = vpop.eup %173 }
  0x3c   :  { %v100_v44 = vsub.f32 1.0, %v174_v40 }
  0x3e   :  { %v101_v47 = vmax.f32 %v100_v44, 0.0 }
  0x40   :  { %v102_v50 = vmul.f32 %v101_v47, %v101_v47 }
  0x74   :  { %v90_v38 = vpop.permute.xlu0 %89 }
  0x75   :  { %v92_v39 = vmul.f32 %v161_v18, %v90_v38 }
  0x77   :  { %v93_v41 = vsel %vm55_vm1, %v92_v39, 0.0 }
  0x78   :  { %v94_v42 = vrot.slane %v93_v41, 4 }
  0x7a   :  { %v95_v43 = vadd.f32 %v94_v42, %v93_v41 }
  0x7c   :  { %v96_v45 = vrot.slane %v95_v43, 2 }
  0x7e   :  { %v97_v46 = vadd.f32 %v96_v45, %v95_v43 }
  0x80   :  { %v98_v48 = vrot.slane %v97_v46, 1 }
  0x82   :  { %v99_v49 = vadd.f32 %v98_v48, %v97_v46 }
  0x84   :  { %v103_v52 = vsub.f32 0.0, %v99_v49 }
  0x86   :  { %v104_v53 = vmul.f32 %v103_v52, %v102_v50 }
  0x88   :  { %v105_v54 = vmul.f32 %v104_v53, %v84_v36 }
  0x8a   :  { %v113_v55 = vsel %vm112_vm3, %v105_v54, 0.0 }
  0x8b   :  { %v115_v56 = vsel %vm114_vm4, %v113_v55, 0.0 }
  0x8c   :  { %116 = vadd.xlane.f32.xlu0 %v115_v56 }
  0xff   :  { %v117_v57 = vpop.xlane.xlu0 %116 }
 0x100   :  { %v118_v58 = vrot.slane %v117_v57, 4 }
 0x102   :  { %v119_v59 = vadd.f32 %v118_v58, %v117_v57 }
 0x104   :  { %v120_v60 = vrot.slane %v119_v59, 2 }
 0x106   :  { %v121_v61 = vadd.f32 %v120_v60, %v119_v59 }
 0x108   :  { %v122_v62 = vrot.slane %v121_v61, 1 }
 0x10a   :  { %v123_v63 = vadd.f32 %v122_v62, %v121_v61 }
 0x10c   :  { %162 = vpush %v123_v63 }
 0x13d   :  { %s163_s20 = spop %162 }
 0x13e   :  { %v132_v1 = vstv %s163_s20 }
 0x13f   :  { %v133_v2 = vadd.f32 %v132_v1, %v131_v0 }
 0x141   :  { %135 = vst.msk [vmem:[#allocation2] sm:$0x1] %vm129_vm0, %v133_v2 }
 0x142   :  { %146 = dma.vmem_to_hbm [thread:$0]  %s142_s1, 16, %s144_s19, [#allocation3]  }
 0x143   :  { %199 = dma.done.wait [#allocation3], 16  }
 0x144   :  { %200 = vsyncadd [#allocation3], 4294967280 }
 0x145   :  { %151 = vsyncpa [#allocation3], 1 }

</bundles_post_ra>
